<compile_context>
chip_gen: v6e
topology: v6e:2x2x1
jax: 0.10.0
libtpu: 0.0.40
codegen_flags: <defaults>
</compile_context>

<pallas_src>
import jax
import jax.numpy as jnp
from jax import lax
from jax.experimental import pallas as pl
from jax.experimental.pallas import tpu as pltpu


def _make_kernel(compute_forces: bool):
    def kernel(pos_ref, ref_ref, batch_ref, w1t_ref, b1t_ref, w2t_ref, w1p_ref,
               b2_ref, energy_ref, *maybe_forces):
        i = pl.program_id(1)                     # inner (reduction) axis

        @pl.when(i == 0)
        def _init():
            energy_ref[...] = jnp.zeros_like(energy_ref)

        pos = pos_ref[...]                       # [3, TN]  xyz on sublanes, atoms on lanes
        w1t = w1t_ref[...]                       # [H, 3]
        b1t = b1t_ref[...]                       # [H, 1]
        w2t = w2t_ref[...]                       # [H, 1]

        # ---- model_forward: per-atom MLP (3 -> H -> 1, tanh), atoms-on-lanes --------
        # h^T [H,TN] = sum_k outer(w1[k,:], pos^T[k,:]) + b1^T : 3 VPU FMAs.
        h = (b1t
             + w1t[:, 0:1] * pos[0:1, :]
             + w1t[:, 1:2] * pos[1:2, :]
             + w1t[:, 2:3] * pos[2:3, :])        # [H, TN]
        t = jnp.tanh(h)                          # [H, TN]  (EUP)
        e_atom = jnp.sum(t * w2t, axis=0, keepdims=True) + b2_ref[0]   # [1, TN]

        # ---- + ReferenceEnergies (pre-gathered in the wrapper) -----------------------
        tot = e_atom + ref_ref[...]              # [1, TN]

        # ---- per-molecule segment-sum: iota mask + ONE lane-reduce per tile ----------
        batch = batch_ref[...]                   # [1, TN] i32 (pad atoms carry id == Bp)
        bp = energy_ref.shape[1]
        mol_ids = lax.broadcasted_iota(jnp.int32, (bp, batch.shape[1]), 0)   # [Bp, TN]
        mask = (mol_ids == batch).astype(jnp.float32)                        # [Bp, TN]
        partial = jnp.sum(mask * tot, axis=1, keepdims=True)                 # [Bp, 1]
        energy_ref[...] += partial[None, :, :]                               # [1, Bp, 1]

        # ---- forces = -dE/dpos as a single MXU matmul + one full-block store ---------
        if compute_forces:
            forces_ref = maybe_forces[0]
            dedh = (1.0 - t * t) * w2t                                        # [H, TN]
            fmat = jnp.dot(w1p_ref[...], dedh,
                           preferred_element_type=jnp.float32)                # [8, TN]
            forces_ref[...] = -fmat[0:3, :]                                   # [3, TN]
    return kernel


def base_model_forward(pos, z, batch, params, num_molecules,
                       compute_forces=True, tile_n=512, num_core_splits=2):
    """JAX/Pallas equivalent of BaseModel.forward -> (energy, forces_or_None)."""
    w1, b1, w2, b2, ref_table = params
    N = pos.shape[0]
    H = w1.shape[1]
    Zmax = ref_table.shape[0]
    B = int(num_molecules)
    Bp = max(8, ((B + 7) // 8) * 8)              # molecule lanes padded to sublane multiple

    chunk = tile_n * num_core_splits
    n_pad = max((N + chunk - 1) // chunk, 1) * chunk
    n_inner = n_pad // chunk
    grid = (num_core_splits, n_inner)

    # ---- host-side layout plumbing (atoms-on-lanes) ----
    pos_t = jnp.zeros((3, n_pad), jnp.float32).at[:, :N].set(
        pos.astype(jnp.float32).T)
    zc = jnp.clip(z.astype(jnp.int32), 0, Zmax - 1)
    ref_vals = ref_table.astype(jnp.float32).reshape(-1)[zc]                 # XLA gather
    ref_row = jnp.zeros((1, n_pad), jnp.float32).at[0, :N].set(ref_vals)
    batch_row = jnp.full((1, n_pad), Bp, jnp.int32).at[0, :N].set(
        batch.astype(jnp.int32))

    w1_t = w1.astype(jnp.float32).T                         # [H, 3]
    b1_t = b1.astype(jnp.float32).reshape(H, 1)             # [H, 1]
    w2_t = w2.astype(jnp.float32).reshape(H, 1)             # [H, 1]
    w1_pad = jnp.zeros((8, H), jnp.float32).at[:3, :].set(
        w1.astype(jnp.float32))                             # [8, H] (rows 3..7 zero)
    b2_s = b2.astype(jnp.float32).reshape(1)                # SMEM scalar

    tile_map = lambda o, i: (0, o * n_inner + i)
    resident = lambda o, i: (0, 0)

    in_specs = [
        pl.BlockSpec((3, tile_n), tile_map),                # pos^T tile
        pl.BlockSpec((1, tile_n), tile_map),                # ref_E[z] tile
        pl.BlockSpec((1, tile_n), tile_map),                # molecule-id tile
        pl.BlockSpec((H, 3), resident),                     # w1^T (resident)
        pl.BlockSpec((H, 1), resident),                     # b1^T (resident)
        pl.BlockSpec((H, 1), resident),                     # w2^T (resident)
        pl.BlockSpec((8, H), resident),                     # w1 padded to 8 rows (resident)
        pl.BlockSpec(memory_space=pltpu.MemorySpace.SMEM),  # b2 scalar
    ]

    energy_shape = jax.ShapeDtypeStruct((num_core_splits, Bp, 1), jnp.float32)
    energy_spec = pl.BlockSpec((1, Bp, 1), lambda o, i: (o, 0, 0))  # per-core partials

    if compute_forces:
        out_shape = (energy_shape, jax.ShapeDtypeStruct((3, n_pad), jnp.float32))
        out_specs = (energy_spec, pl.BlockSpec((3, tile_n), tile_map))
    else:
        out_shape = energy_shape
        out_specs = energy_spec

    cost = pl.CostEstimate(
        flops=int(n_pad * (9 * H + (6 * H if compute_forces else 0) + 4 * Bp)),
        transcendentals=int(n_pad * H),
        bytes_accessed=int(4 * ((5 + (3 if compute_forces else 0)) * n_pad
                                + 6 * H + Bp * num_core_splits + 1)),
    )

    result = pl.pallas_call(
        _make_kernel(compute_forces),
        out_shape=out_shape,
        grid_spec=pltpu.PrefetchScalarGridSpec(
            num_scalar_prefetch=0,
            grid=grid,
            in_specs=in_specs,
            out_specs=out_specs,
        ),
        compiler_params=pltpu.CompilerParams(
            dimension_semantics=("parallel", "arbitrary"),  # 2 TCs on v7x; harmless on v5e/v6e
            vmem_limit_bytes=32 * 1024 * 1024,
        ),
        cost_estimate=cost,
    )(pos_t, ref_row, batch_row, w1_t, b1_t, w2_t, w1_pad, b2_s)

    if compute_forces:
        energy_parts, forces_t = result
    else:
        energy_parts, forces_t = result, None

    energy = energy_parts.sum(axis=0)[:B, 0]                # sum per-core partials -> [B]
    forces = forces_t[:, :N].T if compute_forces else None
    return energy, forces


def _reference_jax(pos, z, batch, params, num_molecules):
    """Pure-JAX reference for correctness checking."""
    w1, b1, w2, b2, ref_table = params

    def per_mol_energy(p):
        t = jnp.tanh(p @ w1 + b1)                              # [N, H]
        e_atom = jnp.sum(t * w2, axis=-1) + b2[0, 0]           # [N]
        ref_atom = ref_table[:, 0][z]                          # [N]
        tot = e_atom + ref_atom
        return jax.ops.segment_sum(tot, batch, num_molecules)  # [B]

    energy = per_mol_energy(pos)
    forces = -jax.grad(lambda p: jnp.sum(per_mol_energy(p)))(pos)
    return energy, forces


if __name__ == "__main__":
    N, B, H, ZMAX = 8, 2, 32, 16   # 8 atoms, 2 molecules, hidden=32, atomic numbers < 16

    key = jax.random.PRNGKey(0)
    k1, k2, k3, k4, k5 = jax.random.split(key, 5)
    w1 = 0.5 * jax.random.normal(k1, (3, H), dtype=jnp.float32)
    b1 = 0.1 * jax.random.normal(k2, (1, H), dtype=jnp.float32)
    w2 = 0.5 * jax.random.normal(k3, (1, H), dtype=jnp.float32)
    b2 = jnp.full((1, 1), 0.05, dtype=jnp.float32)
    ref_table = 2.0 * jax.random.normal(k4, (ZMAX, 1), dtype=jnp.float32)  # frozen ReferenceEnergies
    params = (w1, b1, w2, b2, ref_table)

    pos = jax.random.normal(k5, (N, 3), dtype=jnp.float32)
    z = jnp.array([1, 6, 8, 1, 1, 6, 7, 8], dtype=jnp.int32)
    batch = jnp.array([0, 0, 0, 0, 1, 1, 1, 1], dtype=jnp.int32)

    energy, forces = base_model_forward(pos, z, batch, params, num_molecules=B,
                                        compute_forces=True)
    jax.block_until_ready((energy, forces))

    # also exercise the energy-only specialization
    energy_only, none_forces = base_model_forward(pos, z, batch, params, num_molecules=B,
                                                  compute_forces=False)
    jax.block_until_ready(energy_only)
    assert none_forces is None

    e_ref, f_ref = _reference_jax(pos, z, batch, params, B)
    assert jnp.allclose(energy, e_ref, rtol=1e-5, atol=1e-5), (energy, e_ref)
    assert jnp.allclose(energy_only, e_ref, rtol=1e-5, atol=1e-5), (energy_only, e_ref)
    assert jnp.allclose(forces, f_ref, rtol=1e-5, atol=1e-5), (forces, f_ref)

    print("KERNEL_OK")
</pallas_src>

<mosaic_0001>
module attributes {stable_mosaic.version = 11 : i64} {
  func.func @kernel(%arg0: i32, %arg1: i32, %arg2: memref<3x512xf32, #tpu.memory_space<vmem>>, %arg3: memref<1x512xf32, #tpu.memory_space<vmem>>, %arg4: memref<1x512xi32, #tpu.memory_space<vmem>>, %arg5: memref<32x3xf32, #tpu.memory_space<vmem>>, %arg6: memref<32x1xf32, #tpu.memory_space<vmem>>, %arg7: memref<32x1xf32, #tpu.memory_space<vmem>>, %arg8: memref<8x32xf32, #tpu.memory_space<vmem>>, %arg9: memref<1xf32, #tpu.memory_space<smem>>, %arg10: memref<1x8x1xf32, #tpu.memory_space<vmem>>, %arg11: memref<3x512xf32, #tpu.memory_space<vmem>>) attributes {dimension_semantics = [#tpu.dimension_semantics<parallel>, #tpu.dimension_semantics<arbitrary>], iteration_bounds = array<i64: 2, 1>, scalar_prefetch = 0 : i64, scratch_operands = 0 : i64, tpu.core_type = #tpu.core_type<tc>, window_params = [{transform_indices = @transform_0, window_bounds = array<i64: 3, 512>}, {transform_indices = @transform_1, window_bounds = array<i64: 1, 512>}, {transform_indices = @transform_2, window_bounds = array<i64: 1, 512>}, {pipeline_mode = #tpu.pipeline_mode<synchronous>, transform_indices = @transform_3, window_bounds = array<i64: 32, 3>}, {pipeline_mode = #tpu.pipeline_mode<synchronous>, transform_indices = @transform_4, window_bounds = array<i64: 32, 1>}, {pipeline_mode = #tpu.pipeline_mode<synchronous>, transform_indices = @transform_5, window_bounds = array<i64: 32, 1>}, {pipeline_mode = #tpu.pipeline_mode<synchronous>, transform_indices = @transform_6, window_bounds = array<i64: 8, 32>}, {transform_indices = @transform_7, window_bounds = array<i64: 1>}, {transform_indices = @transform_8, window_bounds = array<i64: 1, 8, 1>}, {transform_indices = @transform_9, window_bounds = array<i64: 3, 512>}]} {
    %c0_i32 = arith.constant 0 : i32
    %0 = arith.cmpi eq, %arg1, %c0_i32 : i32
    %1 = arith.extui %0 : i1 to i32
    %c0_i32_0 = arith.constant 0 : i32
    %2 = arith.cmpi ne, %1, %c0_i32_0 : i32
    scf.if %2 {
      %cst_27 = arith.constant 0.000000e+00 : f32
      %61 = vector.broadcast %cst_27 : f32 to vector<1x8x1xf32>
      %c0_28 = arith.constant 0 : index
      %c0_29 = arith.constant 0 : index
      %c0_30 = arith.constant 0 : index
      %62 = vector.load %arg10[%c0_28, %c0_29, %c0_30] : memref<1x8x1xf32, #tpu.memory_space<vmem>>, vector<1x8x1xf32>
      tpu.vector_store %arg10[%c0_28, %c0_29, %c0_30], %61 {strides = array<i32>} : memref<1x8x1xf32, #tpu.memory_space<vmem>>, vector<1x8x1xf32>,
    } else {
    }
    %c0 = arith.constant 0 : index
    %c0_1 = arith.constant 0 : index
    %3 = vector.load %arg2[%c0, %c0_1] : memref<3x512xf32, #tpu.memory_space<vmem>>, vector<3x512xf32>
    %c0_2 = arith.constant 0 : index
    %c0_3 = arith.constant 0 : index
    %4 = vector.load %arg5[%c0_2, %c0_3] : memref<32x3xf32, #tpu.memory_space<vmem>>, vector<32x3xf32>
    %c0_4 = arith.constant 0 : index
    %c0_5 = arith.constant 0 : index
    %5 = vector.load %arg6[%c0_4, %c0_5] : memref<32x1xf32, #tpu.memory_space<vmem>>, vector<32x1xf32>
    %c0_6 = arith.constant 0 : index
    %c0_7 = arith.constant 0 : index
    %6 = vector.load %arg7[%c0_6, %c0_7] : memref<32x1xf32, #tpu.memory_space<vmem>>, vector<32x1xf32>
    %7 = vector.extract_strided_slice %4 {offsets = [0, 0], sizes = [32, 1], strides = [1, 1]} : vector<32x3xf32> to vector<32x1xf32>
    %8 = vector.extract_strided_slice %3 {offsets = [0, 0], sizes = [1, 512], strides = [1, 1]} : vector<3x512xf32> to vector<1x512xf32>
    %9 = vector.broadcast %7 : vector<32x1xf32> to vector<32x512xf32>
    %10 = vector.broadcast %8 : vector<1x512xf32> to vector<32x512xf32>
    %11 = arith.mulf %9, %10 : vector<32x512xf32>
    %12 = vector.broadcast %5 : vector<32x1xf32> to vector<32x512xf32>
    %13 = arith.addf %12, %11 : vector<32x512xf32>
    %14 = vector.extract_strided_slice %4 {offsets = [0, 1], sizes = [32, 1], strides = [1, 1]} : vector<32x3xf32> to vector<32x1xf32>
    %15 = vector.extract_strided_slice %3 {offsets = [1, 0], sizes = [1, 512], strides = [1, 1]} : vector<3x512xf32> to vector<1x512xf32>
    %16 = vector.broadcast %14 : vector<32x1xf32> to vector<32x512xf32>
    %17 = vector.broadcast %15 : vector<1x512xf32> to vector<32x512xf32>
    %18 = arith.mulf %16, %17 : vector<32x512xf32>
    %19 = arith.addf %13, %18 : vector<32x512xf32>
    %20 = vector.extract_strided_slice %4 {offsets = [0, 2], sizes = [32, 1], strides = [1, 1]} : vector<32x3xf32> to vector<32x1xf32>
    %21 = vector.extract_strided_slice %3 {offsets = [2, 0], sizes = [1, 512], strides = [1, 1]} : vector<3x512xf32> to vector<1x512xf32>
    %22 = vector.broadcast %20 : vector<32x1xf32> to vector<32x512xf32>
    %23 = vector.broadcast %21 : vector<1x512xf32> to vector<32x512xf32>
    %24 = arith.mulf %22, %23 : vector<32x512xf32>
    %25 = arith.addf %19, %24 : vector<32x512xf32>
    %26 = math.tanh %25 : vector<32x512xf32>
    %27 = vector.broadcast %6 : vector<32x1xf32> to vector<32x512xf32>
    %28 = arith.mulf %26, %27 : vector<32x512xf32>
    %cst = arith.constant dense<0.000000e+00> : vector<512xf32>
    %29 = vector.multi_reduction <add>, %28, %cst [0] : vector<32x512xf32> to vector<512xf32>
    %30 = vector.shape_cast %29 : vector<512xf32> to vector<1x512xf32>
    %c0_8 = arith.constant 0 : index
    %31 = memref.load %arg9[%c0_8] : memref<1xf32, #tpu.memory_space<smem>>
    %32 = vector.broadcast %31 : f32 to vector<1x512xf32>
    %33 = arith.addf %30, %32 : vector<1x512xf32>
    %c0_9 = arith.constant 0 : index
    %c0_10 = arith.constant 0 : index
    %34 = vector.load %arg3[%c0_9, %c0_10] : memref<1x512xf32, #tpu.memory_space<vmem>>, vector<1x512xf32>
    %35 = arith.addf %33, %34 : vector<1x512xf32>
    %c0_11 = arith.constant 0 : index
    %c0_12 = arith.constant 0 : index
    %36 = vector.load %arg4[%c0_11, %c0_12] : memref<1x512xi32, #tpu.memory_space<vmem>>, vector<1x512xi32>
    %37 = tpu.iota {dimensions = array<i32: 0>} : vector<8x512xi32>
    %38 = vector.broadcast %36 : vector<1x512xi32> to vector<8x512xi32>
    %39 = arith.cmpi eq, %37, %38 : vector<8x512xi32>
    %40 = arith.extui %39 : vector<8x512xi1> to vector<8x512xi32>
    %41 = arith.sitofp %40 : vector<8x512xi32> to vector<8x512xf32>
    %42 = vector.broadcast %35 : vector<1x512xf32> to vector<8x512xf32>
    %43 = arith.mulf %41, %42 : vector<8x512xf32>
    %cst_13 = arith.constant dense<0.000000e+00> : vector<8xf32>
    %44 = vector.multi_reduction <add>, %43, %cst_13 [1] : vector<8x512xf32> to vector<8xf32>
    %45 = vector.shape_cast %44 : vector<8xf32> to vector<8x1xf32>
    %c0_14 = arith.constant 0 : index
    %c0_15 = arith.constant 0 : index
    %c0_16 = arith.constant 0 : index
    %46 = vector.load %arg10[%c0_14, %c0_15, %c0_16] : memref<1x8x1xf32, #tpu.memory_space<vmem>>, vector<1x8x1xf32>
    %47 = vector.shape_cast %45 : vector<8x1xf32> to vector<1x8x1xf32>
    %48 = arith.addf %46, %47 : vector<1x8x1xf32>
    %c0_17 = arith.constant 0 : index
    %c0_18 = arith.constant 0 : index
    %c0_19 = arith.constant 0 : index
    %49 = vector.load %arg10[%c0_17, %c0_18, %c0_19] : memref<1x8x1xf32, #tpu.memory_space<vmem>>, vector<1x8x1xf32>
    tpu.vector_store %arg10[%c0_17, %c0_18, %c0_19], %48 {strides = array<i32>} : memref<1x8x1xf32, #tpu.memory_space<vmem>>, vector<1x8x1xf32>,
    %50 = arith.mulf %26, %26 : vector<32x512xf32>
    %cst_20 = arith.constant 1.000000e+00 : f32
    %51 = vector.broadcast %cst_20 : f32 to vector<32x512xf32>
    %52 = arith.subf %51, %50 : vector<32x512xf32>
    %53 = vector.broadcast %6 : vector<32x1xf32> to vector<32x512xf32>
    %54 = arith.mulf %52, %53 : vector<32x512xf32>
    %c0_21 = arith.constant 0 : index
    %c0_22 = arith.constant 0 : index
    %55 = vector.load %arg8[%c0_21, %c0_22] : memref<8x32xf32, #tpu.memory_space<vmem>>, vector<8x32xf32>
    %cst_23 = arith.constant dense<0.000000e+00> : vector<8x512xf32>
    %56 = tpu.matmul %55, %54, %cst_23 {dimension_numbers = #tpu.dot_dimension_numbers<[1], [0], [0], [1], [0, 0, 1, 1], [], []>} : vector<8x32xf32>, vector<32x512xf32>, vector<8x512xf32> -> vector<8x512xf32>
    %57 = vector.extract_strided_slice %56 {offsets = [0, 0], sizes = [3, 512], strides = [1, 1]} : vector<8x512xf32> to vector<3x512xf32>
    %cst_24 = arith.constant 0.000000e+00 : f32
    %58 = vector.broadcast %cst_24 : f32 to vector<3x512xf32>
    %59 = arith.subf %58, %57 : vector<3x512xf32>
    %c0_25 = arith.constant 0 : index
    %c0_26 = arith.constant 0 : index
    %60 = vector.load %arg11[%c0_25, %c0_26] : memref<3x512xf32, #tpu.memory_space<vmem>>, vector<3x512xf32>
    tpu.vector_store %arg11[%c0_25, %c0_26], %59 {strides = array<i32>} : memref<3x512xf32, #tpu.memory_space<vmem>>, vector<3x512xf32>,
    return
  }
  func.func @transform_0(%arg0: i32, %arg1: i32) -> (i32, i32) {
    %c1_i32 = arith.constant 1 : i32
    %0 = arith.muli %arg0, %c1_i32 : i32
    %1 = arith.addi %0, %arg1 : i32
    %c0_i32 = arith.constant 0 : i32
    %c0_i32_0 = arith.constant 0 : i32
    return %c0_i32, %1 : i32, i32
  }
  func.func @transform_1(%arg0: i32, %arg1: i32) -> (i32, i32) {
    %c1_i32 = arith.constant 1 : i32
    %0 = arith.muli %arg0, %c1_i32 : i32
    %1 = arith.addi %0, %arg1 : i32
    %c0_i32 = arith.constant 0 : i32
    %c0_i32_0 = arith.constant 0 : i32
    return %c0_i32, %1 : i32, i32
  }
  func.func @transform_2(%arg0: i32, %arg1: i32) -> (i32, i32) {
    %c1_i32 = arith.constant 1 : i32
    %0 = arith.muli %arg0, %c1_i32 : i32
    %1 = arith.addi %0, %arg1 : i32
    %c0_i32 = arith.constant 0 : i32
    %c0_i32_0 = arith.constant 0 : i32
    return %c0_i32, %1 : i32, i32
  }
  func.func @transform_3(%arg0: i32, %arg1: i32) -> (i32, i32) {
    %c0_i32 = arith.constant 0 : i32
    %c0_i32_0 = arith.constant 0 : i32
    %c0_i32_1 = arith.constant 0 : i32
    return %c0_i32, %c0_i32_0 : i32, i32
  }
  func.func @transform_4(%arg0: i32, %arg1: i32) -> (i32, i32) {
    %c0_i32 = arith.constant 0 : i32
    %c0_i32_0 = arith.constant 0 : i32
    %c0_i32_1 = arith.constant 0 : i32
    return %c0_i32, %c0_i32_0 : i32, i32
  }
  func.func @transform_5(%arg0: i32, %arg1: i32) -> (i32, i32) {
    %c0_i32 = arith.constant 0 : i32
    %c0_i32_0 = arith.constant 0 : i32
    %c0_i32_1 = arith.constant 0 : i32
    return %c0_i32, %c0_i32_0 : i32, i32
  }
  func.func @transform_6(%arg0: i32, %arg1: i32) -> (i32, i32) {
    %c0_i32 = arith.constant 0 : i32
    %c0_i32_0 = arith.constant 0 : i32
    %c0_i32_1 = arith.constant 0 : i32
    return %c0_i32, %c0_i32_0 : i32, i32
  }
  func.func @transform_7(%arg0: i32, %arg1: i32) -> i32 {
    %c0_i32 = arith.constant 0 : i32
    %c0_i32_0 = arith.constant 0 : i32
    return %c0_i32 : i32
  }
  func.func @transform_8(%arg0: i32, %arg1: i32) -> (i32, i32, i32) {
    %c0_i32 = arith.constant 0 : i32
    %c0_i32_0 = arith.constant 0 : i32
    %c0_i32_1 = arith.constant 0 : i32
    return %arg0, %c0_i32, %c0_i32_0 : i32, i32, i32
  }
  func.func @transform_9(%arg0: i32, %arg1: i32) -> (i32, i32) {
    %c1_i32 = arith.constant 1 : i32
    %0 = arith.muli %arg0, %c1_i32 : i32
    %1 = arith.addi %0, %arg1 : i32
    %c0_i32 = arith.constant 0 : i32
    %c0_i32_0 = arith.constant 0 : i32
    return %c0_i32, %1 : i32, i32
  }
}

</mosaic_0001>

<bundles_post_ra>
// kernel: tpu_custom_call.1
= control target key start
LH: loop header
LB: loop body
LE: loop exit
PB: predicated region body
PF: predicated region fallthrough
CT: control target
= control target key end

     0   :  { %s1849_s0 = inlined_call_operand.vmem [shape: f32[3,1024], index: 0, kind: input, shape index: {}]   ;;  %s1850_s1 = inlined_call_operand.vmem [shape: f32[1,1024], index: 1, kind: input, shape index: {}]   ;;  %s1851_s2 = inlined_call_operand.vmem [shape: s32[1,1024], index: 2, kind: input, shape index: {}]   ;;  %s1852_s3 = inlined_call_operand.vmem [shape: f32[32,3], index: 3, kind: input, shape index: {}]   ;;  %s1853_s4 = inlined_call_operand.vmem [shape: f32[32,1], index: 4, kind: input, shape index: {}]   ;;  %s1854_s5 = inlined_call_operand.vmem [shape: f32[32,1], index: 5, kind: input, shape index: {}]   ;;  %s1855_s6 = inlined_call_operand.vmem [shape: f32[8,32], index: 6, kind: input, shape index: {}]   ;;  %s1856_s7 = inlined_call_operand.<no memory space> [shape: f32[1], index: 7, kind: input, shape index: {}]   ;;  %s1857_s8 = inlined_call_operand.vmem [shape: f32[2,8,1], index: 8, kind: output, shape index: {0}]   ;;  %s1858_s9 = inlined_call_operand.hbm [shape: f32[3,1024], index: 9, kind: output, shape index: {1}]  }
   0x1   :  { %15 = sst [smem:[#allocation2]] %s1856_s7 }
   0x2   :  { %16 = vsyncpa [#allocation4], 0 }
   0x3   :  { %18 = vsyncpa [#allocation4 + $0x1], 0  ;;  %s1504_s11 = smov 0   ;;  %s1506_s12 = smov 0  }
   0x4   :  { %s1508_s13 = smov 0   ;;  %s1510_s14 = smov 0  }
   0x5   :  { %s1512_s15 = smov 0   ;;  %s1514_s16 = smov 0  }
   0x6 LB: > { %s1240_s7 = sadd.s32 4294967295, %s1444_s16   ;;  %s1241_s17 = sadd.s32 4294967294, %s1444_s16   ;;  %s1444_s16 = sphi %s1514_s16, %s24_s16   ;;  %s1440_s15 = sphi %s1512_s15, %s1865_s15   ;;  %s1436_s14 = sphi %s1510_s14, %s1864_s14   ;;  %s1432_s13 = sphi %s1508_s13, %s1863_s13   ;;  %s1428_s12 = sphi %s1506_s12, %s1862_s12   ;;  %s1424_s11 = sphi %s1504_s11, %s1861_s11  }
   0x7   : > { %s36_s18 = sadd.s32 1, %s1440_s15  ;;  %s260_s19 = sadd.s32 1, %s1432_s13 }
   0x8   : > { %p38_p0 = scmp.ge.s32.totalorder %s36_s18, 2  ;;  %p270_p1 = scmp.ne.s32.totalorder %s1432_s13, %s1428_s12 }
   0x9   : > { %p271_p2 = scmp.eq.s32.totalorder %s1240_s7, 1  ;;  %p276_p3 = scmp.ne.s32.totalorder %s1428_s12, %s1424_s11 }
   0xa   : > { %s1867_s18 = smov (%p38_p0, %s36_s18), 0  ;;  %p277_p5 = scmp.eq.s32.totalorder %s1241_s17, 1 }
   0xb   : > { %p1544_p4 = por %p271_p2, %p270_p1  ;;  %s257_s21 = ssub.s32 %s1440_s15, %s1867_s18 }
   0xc   : > { %p1244_p6 = scmp.ge.s32.totalorder %s1444_s16, 1  ;;  %p258_p7 = scmp.eq.s32.totalorder %s257_s21, 0 }
   0xd   : > { %p1551_p8 = por %p277_p5, %p276_p3  ;;  %p341_p9 = scmp.lt.s32.totalorder %s1444_s16, 3 }
   0xe   : > { %s1557_s23 = scalar_select %p258_p7, %s1432_s13, %s260_s19  }
   0xf   : > { %p342_p10 = pnand %p1244_p6, %p341_p9 }
  0x10   : > { %s1246_s24 = sshll.u32 (!%p342_p10), %s1436_s14, 2  ;;  %p414_p12 = scmp.lt.s32.totalorder (!%p342_p10), %s1436_s14, 1 }
  0x11   : > { %345 = sbr.rel (%p342_p10) target bundleno = 429 (0x1ad), region = 52  ;;  %p394_p11 = scmp.lt.s32.totalorder (!%p342_p10), %s1246_s24, 7 }
  0x12   : > { %s1262_s19 = sshll.u32 (!%p342_p10), %s1436_s14, 8 }
  0x16   : > { %v435_v0 = vld [vmem:[%s1853_s4 + $0x18] sm:$0xff]  ;;  %v430_v1 = vld [vmem:[%s1852_s3 + $0x10] sm:$0xff]  ;;  %v1446_v2 = vmov 1   ;;  %v1447_v3 = vmov 0   ;;  %v429_v6 = vld [vmem:[%s1852_s3 + $0x8] sm:$0xff]  ;;  %v1448_v7 = vmov 2   ;;  %v462_v16 = vlaneseq }
  0x17   : > { %1325 = vset.pattern.permute.xlu0 %v1446_v2  ;;  %1322 = vset.pattern.permute.xlu1 %v1447_v3  ;;  %v431_v4 = vld [vmem:[%s1852_s3 + $0x18] sm:$0xff]  ;;  %v434_v5 = vld [vmem:[%s1853_s4 + $0x10] sm:$0xff]  ;;  %v433_v8 = vld [vmem:[%s1853_s4 + $0x8] sm:$0xff]  ;;  %v1449_v15 = vmov 0.0   ;;  %s1869_s24 = smov (!%p394_p11, %s1246_s24), 7  ;;  %vm424_vm4 = vcmask 7168  }
  0x18   : > { %531 = vperm.xlu1 %1322, %v435_v0   ;;  %559 = vperm.xlu0 %1325, %v430_v1   ;;  %v428_v9 = vld [vmem:[%s1852_s3] sm:$0xff]  ;;  %v438_v11 = vld [vmem:[%s1854_s5 + $0x10] sm:$0xff]  ;;  %v439_v12 = vld [vmem:[%s1854_s5 + $0x18] sm:$0xff]  ;;  %v1596_v17 = vshrl.u32 %v462_v16, 7  ;;  %s411_s27 = scalar_lea.vmem %s1851_s2, %s1869_s24  ;;  %s1247_s17 = sshll.u32 %s1869_s24, 2  ;;  %vm947_vm5 = vcmask 261120  }
  0x19   : > { %v432_v10 = vld [vmem:[%s1853_s4] sm:$0xff]  ;;  %v437_v13 = vld [vmem:[%s1854_s5 + $0x8] sm:$0xff]  ;;  %1015 = vmatprep.mubr.f32.mxu0 %v1449_v15  ;;  %1086 = vmatprep.mubr.f32.mxu1 %v1449_v15  ;;  %s415_s28 = scalar_select %p414_p12, %s1436_s14, 1 }
  0x1a   : > { %v436_v14 = vld [vmem:[%s1854_s5] sm:$0xff]  ;;  %v1605_v18 = vsub.s32 1, %v1596_v17  ;;  %v1608_v19 = vsub.s32 0, %v1596_v17  ;;  %v1611_v20 = vsub.s32 2, %v1596_v17  ;;  %v828_v21 = vsub.s32 3, %v1596_v17  ;;  %s397_s25 = scalar_lea.vmem %s1849_s0, %s1247_s17  ;;  %s404_s10 = scalar_lea.vmem %s1850_s1, %s1869_s24 }
  0x1b   : > { %v838_v22 = vld [vmem:[%s411_s27] sm:$0xf]  ;;  %s1250_s29 = sshll.u32 %s415_s28, 3  ;;  %v468_v32 = vsub.s32 4, %v1596_v17  ;;  %v427_v33 = vld [vmem:[%s397_s25 + $0x8] sm:$0x77] }
  0x1c   : > { %1323 = vset.pattern.permute.xlu1 %v1446_v2  ;;  %1326 = vset.pattern.permute.xlu0 %v1447_v3  ;;  %v844_v23 = vrot.slane %v838_v22, %v1608_v19  ;;  %v848_v24 = vrot.slane %v838_v22, %v1605_v18  ;;  %v852_v25 = vrot.slane %v838_v22, %v1611_v20  ;;  %s1636_s7 = scalar_lea.vmem %s1857_s8, %s1250_s29  ;;  %v426_v31 = vld [vmem:[%s397_s25] sm:$0x77]  ;;  %v572_v39 = vsub.s32 5, %v1596_v17  ;;  %s806_s28 = sld [smem:[#allocation2]] }
  0x1d   : > { %563 = vperm.xlu1 %1323, %v431_v4   ;;  %457 = vperm.xlu0 %1326, %v431_v4   ;;  %v856_v26 = vrot.slane %v838_v22, %v828_v21  ;;  %425 = vst.msk [vmem:[%s1636_s7] sm:$0xff] %vm424_vm4, %v1449_v15  ;;  %v465_v36 = vrot.slane %v426_v31, %v1608_v19  ;;  %v656_v42 = vsub.s32 6, %v1596_v17  ;;  %s389_s24 = sand.u32 1, %s1428_s12   ;;  %s1450_s14 = smov [#allocation3]  }
  0x1e   : > { %vm857_vm0 = vcmp.eq.s32.totalorder %v1596_v17, %v844_v23  ;;  %vm858_vm1 = vcmp.eq.s32.totalorder %v1596_v17, %v848_v24  ;;  %vm859_vm2 = vcmp.eq.s32.totalorder %v1596_v17, %v852_v25  ;;  %v469_v37 = vrot.slane %v426_v31, %v468_v32  ;;  %s1245_s17 = sshll.u32 %s389_s24, 4  ;;  %s1372_s30 = sshll.u32 %s1450_s14, 4  ;;  %s1373_s30 = int_to_ptr.vmem [resolvable:$false] %s1372_s30 }
  0x1f   : > { %vm860_vm3 = vcmp.eq.s32.totalorder %v1596_v17, %v856_v26  ;;  %v1623_v27 = vsel %vm857_vm0, 1.0, %v1449_v15  ;;  %v1625_v28 = vsel %vm858_vm1, 1.0, %v1449_v15  ;;  %v1627_v29 = vsel %vm859_vm2, 1.0, %v1449_v15  ;;  %s391_s21 = scalar_lea.vmem [#allocation3], %s1245_s17 }
  0x20   : > { %v1629_v30 = vsel %vm860_vm3, 1.0, %v1449_v15  ;;  %v477_v38 = vrot.slane %v427_v33, %v468_v32  ;;  %v473_v40 = vrot.slane %v427_v33, %v1608_v19  ;;  %v1651_v41 = vrot.slane %v465_v36, %v1608_v19  ;;  %s1130_s25 = sshll.u32 %s391_s21, 4  ;;  %s1131_s25 = int_to_ptr.vmem [resolvable:$true] %s1130_s25 }
  0x21   : > { %1324 = vset.pattern.permute.xlu1 %v1447_v3  ;;  %452 = vperm.xlu0 %1326, %v430_v1   ;;  %v1655_v45 = vrot.slane %v469_v37, %v1608_v19  ;;  %v569_v46 = vrot.slane %v426_v31, %v1605_v18  ;;  %v573_v48 = vrot.slane %v426_v31, %v572_v39  ;;  %s1368_s29 = scalar_lea.vmem %s1131_s25, 256  ;;  %p1375_p2 = scmp.lt.s32.totalorder %s1131_s25, %s1373_s30 }
  0x22   : > { %526 = vperm.xlu1 %1324, %v434_v5   ;;  %v1659_v47 = vrot.slane %v477_v38, %v1608_v19  ;;  %v581_v49 = vrot.slane %v427_v33, %v572_v39  ;;  %v1662_v50 = vrot.slane %v473_v40, %v1608_v19  ;;  %v653_v52 = vrot.slane %v426_v31, %v1611_v20  ;;  %p1369_p13 = scmp.ne.s32.totalorder %s1131_s25, %s1368_s29 }
  0x23   : > { %v657_v53 = vrot.slane %v426_v31, %v656_v42  ;;  %v665_v54 = vrot.slane %v427_v33, %v656_v42  ;;  %v577_v55 = vrot.slane %v427_v33, %v1605_v18  ;;  %v661_v58 = vrot.slane %v427_v33, %v1611_v20 }
  0x24   : > { %v1670_v59 = vrot.slane %v569_v46, %v1605_v18  ;;  %v1674_v62 = vrot.slane %v573_v48, %v1605_v18  ;;  %v1677_v63 = vrot.slane %v581_v49, %v1605_v18  ;;  %p1370_p0 = pnand %p1369_p13, %p1544_p4 }
  0x25   : > { %447 = vperm.xlu0 %1326, %v429_v6   ;;  %v1690_v5 = vrot.slane %v577_v55, %v1605_v18 }
  0x26   : > { %1327 = vset.pattern.permute.xlu1 %v1448_v7  ;;  %p1371_p1 = pneg %p1370_p0 }
  0x27   : > { %647 = vperm.xlu1 %1327, %v431_v4   ;;  %v1687_v4 = vrot.slane %v665_v54, %v1611_v20 }
  0x29   : > { %521 = vperm.xlu0 %1326, %v433_v8   ;;  %v1693_v8 = vrot.slane %v661_v58, %v1611_v20 }
  0x2b   : > { %1328 = vset.pattern.permute.xlu1 %v1447_v3 }
  0x2c   : > { %442 = vperm.xlu1 %1328, %v428_v9  }
  0x2d   : > { %516 = vperm.xlu0 %1326, %v432_v10  }
  0x30   : > { %1329 = vset.pattern.permute.xlu1 %v1446_v2 }
  0x31   : > { %555 = vperm.xlu1 %1329, %v429_v6   ;;  %1332 = vset.pattern.permute.xlu0 %v1448_v7 }
  0x32   : > { %639 = vperm.xlu0 %1332, %v429_v6  }
  0x35   : > { %1330 = vset.pattern.permute.xlu1 %v1448_v7 }
  0x36   : > { %643 = vperm.xlu1 %1330, %v430_v1   ;;  %1335 = vset.pattern.permute.xlu0 %v1447_v3 }
  0x37   : > { %746 = vperm.xlu0 %1335, %v438_v11  }
  0x3a   : > { %1331 = vset.pattern.permute.xlu1 %v1446_v2  ;;  %v1681_v2 = vrot.slane %v653_v52, %v1611_v20 }
  0x3b   : > { %551 = vperm.xlu1 %1331, %v428_v9  }
  0x3f   : > { %1333 = vset.pattern.permute.xlu1 %v1448_v7 }
  0x40   : > { %635 = vperm.xlu1 %1333, %v428_v9  }
  0x44   : > { %1334 = vset.pattern.permute.xlu1 %v1447_v3  ;;  %v1684_v3 = vrot.slane %v657_v53, %v1611_v20 }
  0x45   : > { %751 = vperm.xlu1 %1334, %v439_v12  }
  0x49   : > { %741 = vperm.xlu1 %1334, %v437_v13  }
  0x4d   : > { %736 = vperm.xlu1 %1334, %v436_v14  }
  0x93   : > { %v532_v34 = vpop.permute.xlu1 %531  ;;  %v1645_v35 = vpop.permute.xlu0 %559 }
  0x94   : > { %v610_v52 = vmul.f32 %v1670_v59, %v1645_v35  ;;  %v611_v53 = vmul.f32 %v1674_v62, %v1645_v35  ;;  %v612_v54 = vmul.f32 %v1690_v5, %v1645_v35 }
  0x98   : > { %v564_v43 = vpop.permute.xlu1 %563  ;;  %v458_v44 = vpop.permute.xlu0 %457 }
  0x99   : > { %v510_v51 = vmul.f32 %v1651_v41, %v458_v44  ;;  %v511_v56 = vmul.f32 %v1655_v45, %v458_v44  ;;  %v513_v60 = vmul.f32 %v1659_v47, %v458_v44  ;;  %v512_v0 = vmul.f32 %v1662_v50, %v458_v44 }
  0x9a   : > { %v614_v9 = vmul.f32 %v1670_v59, %v564_v43  ;;  %v615_v11 = vmul.f32 %v1674_v62, %v564_v43  ;;  %v617_v12 = vmul.f32 %v1677_v63, %v564_v43  ;;  %v616_v24 = vmul.f32 %v1690_v5, %v564_v43 }
  0x9b   : > { %v546_v1 = vadd.f32 %v532_v34, %v510_v51  ;;  %v547_v6 = vadd.f32 %v532_v34, %v511_v56  ;;  %v549_v10 = vadd.f32 %v532_v34, %v513_v60  ;;  %v548_v13 = vadd.f32 %v532_v34, %v512_v0 }
  0x9c   : > { %v453_v57 = vpop.permute.xlu0 %452  ;;  %v613_v56 = vmul.f32 %v1677_v63, %v1645_v35 }
  0x9d   : > { %v527_v61 = vpop.permute.xlu1 %526  ;;  %v630_v15 = vadd.f32 %v614_v9, %v546_v1  ;;  %v631_v25 = vadd.f32 %v615_v11, %v547_v6  ;;  %v633_v32 = vadd.f32 %v617_v12, %v549_v10  ;;  %v506_v36 = vmul.f32 %v1651_v41, %v453_v57 }
  0x9e   : > { %v507_v34 = vmul.f32 %v1655_v45, %v453_v57  ;;  %v632_v37 = vadd.f32 %v616_v24, %v548_v13  ;;  %v508_v39 = vmul.f32 %v1662_v50, %v453_v57  ;;  %v509_v40 = vmul.f32 %v1659_v47, %v453_v57 }
  0x9f   : > { %v542_v57 = vadd.f32 %v527_v61, %v506_v36 }
  0xa0   : > { %v448_v7 = vpop.permute.xlu0 %447  ;;  %v543_v58 = vadd.f32 %v527_v61, %v507_v34  ;;  %v544_v60 = vadd.f32 %v527_v61, %v508_v39  ;;  %v545_v0 = vadd.f32 %v527_v61, %v509_v40 }
  0xa1   : > { %v502_v42 = vmul.f32 %v1651_v41, %v448_v7  ;;  %v503_v46 = vmul.f32 %v1655_v45, %v448_v7  ;;  %v504_v48 = vmul.f32 %v1662_v50, %v448_v7  ;;  %v505_v49 = vmul.f32 %v1659_v47, %v448_v7 }
  0xa2   : > { %v648_v14 = vpop.permute.xlu1 %647 }
  0xa3   : > { %v698_v16 = vmul.f32 %v1681_v2, %v648_v14  ;;  %v699_v22 = vmul.f32 %v1684_v3, %v648_v14  ;;  %v701_v23 = vmul.f32 %v1687_v4, %v648_v14  ;;  %v700_v26 = vmul.f32 %v1693_v8, %v648_v14 }
  0xa4   : > { %v522_v31 = vpop.permute.xlu0 %521 }
  0xa5   : > { %v714_v33 = vadd.f32 %v698_v16, %v630_v15  ;;  %v715_v38 = vadd.f32 %v699_v22, %v631_v25  ;;  %v717_v44 = vadd.f32 %v701_v23, %v633_v32  ;;  %v716_v51 = vadd.f32 %v700_v26, %v632_v37 }
  0xa6   : > { %v538_v1 = vadd.f32 %v522_v31, %v502_v42  ;;  %v539_v6 = vadd.f32 %v522_v31, %v503_v46  ;;  %v540_v7 = vadd.f32 %v522_v31, %v504_v48  ;;  %v541_v9 = vadd.f32 %v522_v31, %v505_v49 }
  0xa7   : > { %v443_v43 = vpop.permute.xlu1 %442  ;;  %1336 = vtanh.f32 %v714_v33  ;;  %v626_v31 = vadd.f32 %v610_v52, %v542_v57  ;;  %v627_v32 = vadd.f32 %v611_v53, %v543_v58  ;;  %v628_v46 = vadd.f32 %v612_v54, %v544_v60 }
  0xa8   : > { %v1717_v55 = vpop.permute.xlu0 %516  ;;  %1338 = vtanh.f32 %v715_v38  ;;  %v629_v48 = vadd.f32 %v613_v56, %v545_v0  ;;  %v498_v49 = vmul.f32 %v1651_v41, %v443_v43  ;;  %v499_v53 = vmul.f32 %v1655_v45, %v443_v43 }
  0xa9   : > { %1340 = vtanh.f32 %v717_v44  ;;  %v500_v57 = vmul.f32 %v1662_v50, %v443_v43 }
  0xaa   : > { %1342 = vtanh.f32 %v716_v51  ;;  %v534_v50 = vadd.f32 %v1717_v55, %v498_v49 }
  0xac   : > { %v556_v10 = vpop.permute.xlu1 %555 }
  0xad   : > { %v606_v11 = vmul.f32 %v1670_v59, %v556_v10  ;;  %v607_v12 = vmul.f32 %v1674_v62, %v556_v10  ;;  %v608_v13 = vmul.f32 %v1690_v5, %v556_v10  ;;  %v609_v35 = vmul.f32 %v1677_v63, %v556_v10  ;;  %v640_v14 = vpop.permute.xlu0 %639 }
  0xae   : > { %v690_v15 = vmul.f32 %v1681_v2, %v640_v14  ;;  %v691_v61 = vmul.f32 %v1684_v3, %v640_v14  ;;  %v692_v16 = vmul.f32 %v1693_v8, %v640_v14  ;;  %v693_v22 = vmul.f32 %v1687_v4, %v640_v14 }
  0xaf   : > { %v622_v23 = vadd.f32 %v606_v11, %v538_v1  ;;  %v623_v24 = vadd.f32 %v607_v12, %v539_v6  ;;  %v624_v25 = vadd.f32 %v608_v13, %v540_v7  ;;  %v625_v26 = vadd.f32 %v609_v35, %v541_v9 }
  0xb0   : > { %v501_v6 = vmul.f32 %v1659_v47, %v443_v43  ;;  %v535_v47 = vadd.f32 %v1717_v55, %v499_v53  ;;  %v536_v43 = vadd.f32 %v1717_v55, %v500_v57 }
  0xb1   : > { %v706_v33 = vadd.f32 %v690_v15, %v622_v23  ;;  %v707_v36 = vadd.f32 %v691_v61, %v623_v24  ;;  %v708_v34 = vadd.f32 %v692_v16, %v624_v25  ;;  %v709_v37 = vadd.f32 %v693_v22, %v625_v26  ;;  %v644_v38 = vpop.permute.xlu1 %643 }
  0xb2   : > { %v694_v39 = vmul.f32 %v1681_v2, %v644_v38  ;;  %v695_v40 = vmul.f32 %v1684_v3, %v644_v38  ;;  %v696_v42 = vmul.f32 %v1693_v8, %v644_v38  ;;  %v697_v44 = vmul.f32 %v1687_v4, %v644_v38 }
  0xb3   : > { %1344 = vtanh.f32 %v706_v33 }
  0xb4   : > { %1346 = vtanh.f32 %v707_v36  ;;  %v710_v51 = vadd.f32 %v694_v39, %v626_v31  ;;  %v711_v52 = vadd.f32 %v695_v40, %v627_v32  ;;  %v712_v58 = vadd.f32 %v696_v42, %v628_v46  ;;  %v1736_v1 = vpop.eup %1336 }
  0xb5   : > { %1348 = vtanh.f32 %v708_v34  ;;  %v713_v7 = vadd.f32 %v697_v44, %v629_v48  ;;  %v1739_v56 = vpop.eup %1338 }
  0xb6   : > { %1350 = vtanh.f32 %v709_v37  ;;  %v552_v54 = vpop.permute.xlu1 %551  ;;  %v1744_v0 = vpop.eup %1340 }
  0xb7   : > { %1352 = vtanh.f32 %v710_v51  ;;  %v602_v41 = vmul.f32 %v1670_v59, %v552_v54  ;;  %v603_v60 = vmul.f32 %v1674_v62, %v552_v54  ;;  %v604_v45 = vmul.f32 %v1690_v5, %v552_v54  ;;  %v1747_v9 = vpop.eup %1342  ;;  %v747_v51 = vpop.permute.xlu0 %746 }
  0xb8   : > { %1354 = vtanh.f32 %v711_v52  ;;  %v605_v10 = vmul.f32 %v1677_v63, %v552_v54  ;;  %v537_v59 = vadd.f32 %v1717_v55, %v501_v6  ;;  %v911_v62 = vmul.f32 %v1739_v56, %v1739_v56 }
  0xb9   : > { %1356 = vtanh.f32 %v712_v58  ;;  %v910_v5 = vmul.f32 %v1736_v1, %v1736_v1  ;;  %v618_v11 = vadd.f32 %v602_v41, %v534_v50  ;;  %v619_v12 = vadd.f32 %v603_v60, %v535_v47 }
  0xba   : > { %1358 = vtanh.f32 %v713_v7  ;;  %v620_v13 = vadd.f32 %v604_v45, %v536_v43  ;;  %v913_v14 = vmul.f32 %v1744_v0, %v1744_v0  ;;  %v621_v16 = vadd.f32 %v605_v10, %v537_v59 }
  0xbb   : > { %v636_v35 = vpop.permute.xlu1 %635  ;;  %v912_v22 = vmul.f32 %v1747_v9, %v1747_v9  ;;  %v927_v33 = vsub.f32 1.0, %v911_v62  ;;  %v926_v36 = vsub.f32 1.0, %v910_v5 }
  0xbc   : > { %v686_v15 = vmul.f32 %v1681_v2, %v636_v35  ;;  %v687_v63 = vmul.f32 %v1684_v3, %v636_v35  ;;  %v688_v55 = vmul.f32 %v1693_v8, %v636_v35  ;;  %v689_v61 = vmul.f32 %v1687_v4, %v636_v35 }
  0xbd   : > { %v929_v2 = vsub.f32 1.0, %v913_v14  ;;  %v928_v8 = vsub.f32 1.0, %v912_v22 }
  0xbe   : > { %v702_v23 = vadd.f32 %v686_v15, %v618_v11  ;;  %v703_v24 = vadd.f32 %v687_v63, %v619_v12  ;;  %v704_v25 = vadd.f32 %v688_v55, %v620_v13  ;;  %v705_v26 = vadd.f32 %v689_v61, %v621_v16 }
  0xc0   : > { %v1345_v31 = vpop.eup %1344  ;;  %1360 = vtanh.f32 %v702_v23  ;;  %v1765_v32 = vpop.permute.xlu1 %751 }
  0xc1   : > { %v1347_v3 = vpop.eup %1346  ;;  %1362 = vtanh.f32 %v703_v24  ;;  %v943_v4 = vmul.f32 %v927_v33, %v1765_v32  ;;  %v945_v37 = vmul.f32 %v929_v2, %v1765_v32  ;;  %v942_v38 = vmul.f32 %v926_v36, %v1765_v32 }
  0xc2   : > { %v1349_v34 = vpop.eup %1348  ;;  %1364 = vtanh.f32 %v704_v25  ;;  %v944_v40 = vmul.f32 %v928_v8, %v1765_v32  ;;  %v903_v44 = vmul.f32 %v1347_v3, %v1347_v3  ;;  %v902_v48 = vmul.f32 %v1345_v31, %v1345_v31 }
  0xc3   : > { %v1351_v39 = vpop.eup %1350  ;;  %1366 = vtanh.f32 %v705_v26  ;;  %975 = vmatprep.subr.mxu0 %v943_v4  ;;  %1046 = vmatprep.subr.mxu1 %v945_v37  ;;  %v1773_v58 = vmul.f32 %v1736_v1, %v1765_v32  ;;  %v904_v41 = vmul.f32 %v1349_v34, %v1349_v34  ;;  %v1777_v60 = vmul.f32 %v1739_v56, %v1765_v32 }
  0xc4   : > { %v1353_v42 = vpop.eup %1352  ;;  %976 = vmatpush1.msra.mxu0 %v942_v38  ;;  %1047 = vmatpush1.msra.mxu1 %v944_v40  ;;  %v905_v53 = vmul.f32 %v1351_v39, %v1351_v39  ;;  %v742_v6 = vpop.permute.xlu1 %741  ;;  %v919_v47 = vsub.f32 1.0, %v903_v44  ;;  %v918_v62 = vsub.f32 1.0, %v902_v48 }
  0xc5   : > { %v1355_v46 = vpop.eup %1354  ;;  %v906_v7 = vmul.f32 %v1353_v42, %v1353_v42  ;;  %v762_v43 = vmul.f32 %v1353_v42, %v747_v51  ;;  %v758_v5 = vmul.f32 %v1345_v31, %v742_v6  ;;  %v759_v13 = vmul.f32 %v1347_v3, %v742_v6 }
  0xc6   : > { %v1357_v49 = vpop.eup %1356  ;;  %v907_v52 = vmul.f32 %v1355_v46, %v1355_v46  ;;  %v921_v1 = vsub.f32 1.0, %v905_v53  ;;  %v920_v15 = vsub.f32 1.0, %v904_v41  ;;  %v763_v63 = vmul.f32 %v1355_v46, %v747_v51 }
  0xc7   : > { %v1359_v57 = vpop.eup %1358  ;;  %v908_v54 = vmul.f32 %v1357_v49, %v1357_v49  ;;  %v922_v10 = vsub.f32 1.0, %v906_v7  ;;  %v760_v55 = vmul.f32 %v1349_v34, %v742_v6  ;;  %v935_v61 = vmul.f32 %v919_v47, %v742_v6 }
  0xc8   : > { %v923_v45 = vsub.f32 1.0, %v907_v52  ;;  %v909_v50 = vmul.f32 %v1359_v57, %v1359_v57  ;;  %v764_v22 = vmul.f32 %v1357_v49, %v747_v51  ;;  %v765_v23 = vmul.f32 %v1359_v57, %v747_v51  ;;  %v737_v24 = vpop.permute.xlu1 %736 }
  0xc9   : > { %v924_v59 = vsub.f32 1.0, %v908_v54  ;;  %v938_v35 = vmul.f32 %v922_v10, %v747_v51  ;;  %v761_v25 = vmul.f32 %v1351_v39, %v742_v6  ;;  %v934_v26 = vmul.f32 %v918_v62, %v742_v6  ;;  %v946_v10 = vld [vmem:[%s1855_s6] sm:$0xff] }
  0xca   : > { %v939_v11 = vmul.f32 %v923_v45, %v747_v51  ;;  %v925_v12 = vsub.f32 1.0, %v909_v50  ;;  %v937_v2 = vmul.f32 %v921_v1, %v742_v6  ;;  %v936_v34 = vmul.f32 %v920_v15, %v742_v6 }
  0xcb   : > { %v940_v14 = vmul.f32 %v924_v59, %v747_v51  ;;  %v768_v45 = vmul.f32 %v1747_v9, %v1765_v32  ;;  %v769_v62 = vmul.f32 %v1744_v0, %v1765_v32 }
  0xcc   : > { %977 = vmatprep.subr.mxu0 %v939_v11  ;;  %v941_v56 = vmul.f32 %v925_v12, %v747_v51 }
  0xcd   : > { %v1361_v16 = vpop.eup %1360  ;;  %978 = vmatpush1.msra.mxu0 %v938_v35 }
  0xce   : > { %v1363_v31 = vpop.eup %1362  ;;  %v754_v33 = vmul.f32 %v1361_v16, %v737_v24  ;;  %1048 = vmatprep.subr.mxu1 %v941_v56  ;;  %979 = vmatprep.subr.mxu0 %v935_v61  ;;  %v898_v36 = vmul.f32 %v1361_v16, %v1361_v16 }
  0xcf   : > { %v1365_v3 = vpop.eup %1364  ;;  %v755_v8 = vmul.f32 %v1363_v31, %v737_v24  ;;  %1049 = vmatpush1.msra.mxu1 %v940_v14  ;;  %980 = vmatpush1.msra.mxu0 %v934_v26  ;;  %v899_v4 = vmul.f32 %v1363_v31, %v1363_v31  ;;  %v807_v31 = vstv %s806_s28  ;;  %s1112_s28 = scalar_lea.sflag [#allocation4], %s389_s24 }
  0xd0   : > { %v1367_v37 = vpop.eup %1366  ;;  %v756_v38 = vmul.f32 %v1365_v3, %v737_v24  ;;  %v770_v40 = vadd.f32 %v758_v5, %v754_v33  ;;  %1050 = vmatprep.subr.mxu1 %v937_v2  ;;  %v914_v39 = vsub.f32 1.0, %v898_v36  ;;  %v900_v42 = vmul.f32 %v1365_v3, %v1365_v3 }
  0xd1   : > { %v757_v44 = vmul.f32 %v1367_v37, %v737_v24  ;;  %v779_v46 = vadd.f32 %v759_v13, %v755_v8  ;;  %1051 = vmatpush1.msra.mxu1 %v936_v34  ;;  %v915_v48 = vsub.f32 1.0, %v899_v4  ;;  %v901_v49 = vmul.f32 %v1367_v37, %v1367_v37 }
  0xd2   : > { %v771_v51 = vadd.f32 %v770_v40, %v762_v43  ;;  %v788_v52 = vadd.f32 %v760_v55, %v756_v38  ;;  %v930_v53 = vmul.f32 %v914_v39, %v737_v24  ;;  %v916_v57 = vsub.f32 1.0, %v900_v42 }
  0xd3   : > { %v780_v7 = vadd.f32 %v779_v46, %v763_v63  ;;  %v797_v54 = vadd.f32 %v761_v25, %v757_v44  ;;  %v931_v6 = vmul.f32 %v915_v48, %v737_v24  ;;  %v917_v41 = vsub.f32 1.0, %v901_v49 }
  0xd4   : > { %v789_v50 = vadd.f32 %v788_v52, %v764_v22  ;;  %v932_v47 = vmul.f32 %v916_v57, %v737_v24  ;;  %v772_v59 = vadd.f32 %v771_v51, %v1773_v58  ;;  %v812_v22 = vld [vmem:[%s404_s10] sm:$0xf]  ;;  %s1374_s10 = scalar_lea.vmem %s1373_s30, 512 }
  0xd5   : > { %981 = vmatprep.subr.mxu0 %v931_v6  ;;  %v933_v43 = vmul.f32 %v917_v41, %v737_v24  ;;  %v781_v5 = vadd.f32 %v780_v7, %v1777_v60  ;;  %v798_v11 = vadd.f32 %v797_v54, %v765_v23  ;;  %v817_v36 = vrot.slane %v812_v22, %v1608_v19  ;;  %p1376_p3 = scmp.lt.s32.totalorder %s1374_s10, %s1368_s29 }
  0xd6   : > { %982 = vmatpush1.msra.mxu0 %v930_v53  ;;  %v773_v12 = vrot.slane %v772_v59, 4  ;;  %v790_v9 = vadd.f32 %v789_v50, %v768_v45  ;;  %v821_v34 = vrot.slane %v812_v22, %v1605_v18  ;;  %v825_v38 = vrot.slane %v812_v22, %v1611_v20  ;;  %v894_v50 = vld [vmem:[%s1636_s7] sm:$0xff] }
  0xd7   : > { %1052 = vmatprep.subr.mxu1 %v933_v43  ;;  %1255 = vmatmul.mubr.msk.f32.vlgmr.msra.gmra.mxu0 %vm947_vm5, %v946_v10  ;;  %v782_v1 = vrot.slane %v781_v5, 4  ;;  %v799_v13 = vadd.f32 %v798_v11, %v769_v62  ;;  %v829_v42 = vrot.slane %v812_v22, %v828_v21  ;;  %p1377_p5 = por %p1376_p3, %p1375_p2 }
  0xd8   : > { %1053 = vmatpush1.msra.mxu1 %v932_v47  ;;  %v774_v58 = vadd.f32 %v773_v12, %v772_v59  ;;  %v791_v35 = vrot.slane %v790_v9, 4 }
  0xd9   : > { %1256 = vmatmul.mubr.msk.f32.vlgmr.msra.gmra.mxu1 %vm947_vm5, %v946_v10  ;;  %v783_v14 = vadd.f32 %v782_v1, %v781_v5  ;;  %v800_v0 = vrot.slane %v799_v13, 4  ;;  %p1378_p6 = pnand %p1377_p5, %p1371_p1 }
  0xda   : > { %v775_v32 = vrot.slane %v774_v58, 2  ;;  %v792_v60 = vadd.f32 %v791_v35, %v790_v9 }
  0xdb   : > { %v784_v15 = vrot.slane %v783_v14, 2  ;;  %v801_v63 = vadd.f32 %v800_v0, %v799_v13 }
  0xdc   : > { %v776_v55 = vadd.f32 %v775_v32, %v774_v58  ;;  %v793_v56 = vrot.slane %v792_v60, 2 }
  0xdd   : > { %v785_v61 = vadd.f32 %v784_v15, %v783_v14  ;;  %v802_v16 = vrot.slane %v801_v63, 2 }
  0xde   : > { %v777_v23 = vrot.slane %v776_v55, 1  ;;  %v794_v24 = vadd.f32 %v793_v56, %v792_v60 }
  0xdf   : > { %v786_v25 = vrot.slane %v785_v61, 1  ;;  %v803_v26 = vadd.f32 %v802_v16, %v801_v63 }
  0xe0   : > { %v778_v33 = vadd.f32 %v777_v23, %v776_v55  ;;  %v795_v2 = vrot.slane %v794_v24, 1 }
  0xe1   : > { %v787_v3 = vadd.f32 %v786_v25, %v785_v61  ;;  %v804_v8 = vrot.slane %v803_v26, 1 }
  0xe2   : > { %v796_v4 = vadd.f32 %v795_v2, %v794_v24  ;;  %v808_v37 = vadd.f32 %v807_v31, %v778_v33 }
  0xe3   : > { %v805_v40 = vadd.f32 %v804_v8, %v803_v26  ;;  %v809_v39 = vadd.f32 %v807_v31, %v787_v3 }
  0xe4   : > { %v810_v44 = vadd.f32 %v807_v31, %v796_v4  ;;  %v834_v46 = vadd.f32 %v817_v36, %v808_v37 }
  0xe5   : > { %v811_v48 = vadd.f32 %v807_v31, %v805_v40  ;;  %v835_v49 = vadd.f32 %v821_v34, %v809_v39 }
  0xe6   : > { %v836_v51 = vadd.f32 %v825_v38, %v810_v44  ;;  %v872_v52 = vrot.slane %v834_v46, %v1608_v19 }
  0xe7   : > { %v837_v53 = vadd.f32 %v829_v42, %v811_v48  ;;  %v876_v18 = vrot.slane %v835_v49, %v1608_v19 }
  0xe8   : > { %v880_v20 = vrot.slane %v836_v51, %v1608_v19  ;;  %v885_v57 = vmul.f32 %v1623_v27, %v872_v52 }
  0xe9   : > { %v884_v17 = vrot.slane %v837_v53, %v1608_v19  ;;  %v886_v21 = vmul.f32 %v1625_v28, %v876_v18 }
  0xea   : > { %v887_v7 = vmul.f32 %v1627_v29, %v880_v20 }
  0xeb   : > { %v888_v54 = vmul.f32 %v1629_v30, %v884_v17  ;;  %v889_v6 = vadd.f32 %v886_v21, %v885_v57 }
  0xed   : > { %v890_v41 = vadd.f32 %v889_v6, %v887_v7 }
  0xef   : > { %v891_v45 = vadd.f32 %v890_v41, %v888_v54 }
  0xf1   : > { %892 = vadd.xlane.f32.xlu0 %v891_v45 }
 0x17a   : > { %v893_v47 = vpop.xlane.xlu0 %892 }
 0x17b   : > { %v895_v10 = vadd.f32 %v894_v50, %v893_v47 }
 0x17d   : > { %897 = vst.msk [vmem:[%s1636_s7] sm:$0xff] %vm424_vm4, %v895_v10  ;;  %s1128_s7 = scalar_lea.hbm %s1858_s9, %s1262_s19 }
 0x197   : > { %v1017_v27 = vpop.f32.mrf.mxu0 }
 0x198   : > { %v1093_v28 = vsub.f32 0.0, %v1017_v27 }
 0x199   : > { %v1088_v19 = vpop.f32.mrf.mxu1  ;;  %v1019_v59 = vpop.f32.mrf.mxu0 }
 0x19a   : > { %v1094_v43 = vsub.f32 0.0, %v1019_v59  ;;  %v1095_v30 = vsub.f32 0.0, %v1088_v19 }
 0x19b   : > { %v1090_v29 = vpop.f32.mrf.mxu1 }
 0x19c   : > { %v1101_v62 = vcombine.low %v1093_v28, %v1094_v43  ;;  %v1096_v5 = vsub.f32 0.0, %v1090_v29 }
 0x19e   : > { %1105 = vst [vmem:[%s391_s21] sm:$0x77] %v1101_v62  ;;  %v1102_v11 = vcombine.low %v1095_v30, %v1096_v5 }
 0x1a0   : > { %1106 = vst [vmem:[%s391_s21 + $0x8] sm:$0x77] %v1102_v11 }
 0x1a1   : > { %1381 = shalt.err (!%p1378_p6)
}
 0x1a2   : > { %s1382_s17 = scalar_lea.hbm %s1128_s7, 256  ;;  %s1386_s21 = scalar_lea.hbm %s1858_s9, 512 }
 0x1a3   : > { %p1383_p7 = scmp.ne.s32.totalorder %s1128_s7, %s1382_s17  ;;  %p1387_p11 = scmp.lt.s32.totalorder %s1128_s7, %s1858_s9 }
 0x1a4   : > { %p1388_p12 = scmp.lt.s32.totalorder %s1386_s21, %s1382_s17 }
 0x1a5   : > { %p1384_p9 = pnand %p1383_p7, %p1544_p4 }
 0x1a6   : > { %p1389_p13 = por %p1388_p12, %p1387_p11 }
 0x1a7   : > { %p1385_p10 = pneg %p1384_p9 }
 0x1a9   : > { %p1390_p0 = pnand %p1389_p13, %p1385_p10 }
 0x1ab   : > { %1393 = shalt.err (!%p1390_p0)
}
 0x1ac   : > { %1263 = dma.vmem_to_hbm [thread:$0]  (%p1544_p4), %s1131_s25, 256, %s1128_s7, %s1112_s28  }
 0x1ad PF: > { %p1269_p1 = scmp.ge.s32.totalorder %s1444_s16, 2  ;;  %s1149_s29 = sand.u32 1, %s1424_s11  }
 0x1ae   : > { %s1150_s14 = scalar_lea.sflag [#allocation4], %s1149_s29 }
 0x1af   : > { %p1266_p2 = pnand %p1269_p1, %p1551_p8 }
 0x1b1   : > { %p1267_p3 = pneg %p1266_p2 }
 0x1b3   : > { %1419 = dma.done.wait (%p1267_p3), %s1150_s14, 256  }
 0x1b4   : > { %1421 = vsyncadd (%p1267_p3), %s1150_s14, 4294967040  ;;  %s24_s16 = sadd.s32 1, %s1444_s16   ;;  %s1861_s11 = smov %s1428_s12 }
 0x1b5   : > { %p21_p5 = scmp.ge.s32.totalorder %s24_s16, 4   ;;  %s1862_s12 = smov %s1432_s13 }
 0x1b6   : > { %s1863_s13 = smov %s1557_s23  ;;  %s1864_s14 = smov %s1440_s15 }
 0x1b7   : > { %s1865_s15 = smov %s1867_s18  ;;  %23 = sbr.rel (!%p21_p5) target bundleno = 6 (0x6), region = 109 }
 0x1bc   :  { %1155 = vsyncpa [#allocation4], 1 }
 0x1bd   :  { %1157 = vsyncpa [#allocation4 + $0x1], 1 }

</bundles_post_ra>
